<compile_context>
chip_gen: v6e
topology: v6e:2x2x1
jax: 0.10.0
libtpu: 0.0.40
codegen_flags: <defaults>
</compile_context>

<pallas_src>
import functools

import jax
import jax.numpy as jnp
from jax import lax
from jax.experimental import pallas as pl
from jax.experimental.pallas import tpu as pltpu

SMOOTHING = 0.1


def _round_up(a: int, b: int) -> int:
    return (a + b - 1) // b * b


def _make_kernel(n_true: int, c_true: int, smoothing: float):
    confidence = 1.0 - smoothing
    smooth_w = smoothing / c_true

    def kernel(cls_ref, x_ref, tgt_ref, out_ref):
        pid = pl.program_id(0)

        x = x_ref[...].astype(jnp.float32)                 # (TM, C)
        tm = x.shape[0]

        # log-sum-exp over the (full) class dimension.
        m = jnp.max(x, axis=-1, keepdims=True)             # (TM, 1)
        shifted = x - m                                     # (TM, C), <= 0
        sumexp = jnp.sum(jnp.exp(shifted), axis=-1, keepdims=True)
        lse = jnp.log(sumexp)                               # (TM, 1)

        # Target term: shifted logit at the target class (one-hot row-sum).
        tgt = tgt_ref[...]                                  # (TM, 1) int32
        onehot_sum = jnp.sum(
            jnp.where(cls_ref[...] == tgt, shifted, 0.0),
            axis=-1, keepdims=True)                         # (TM, 1)
        # Smoothing term: uniform weight over all (true) classes.
        row_sum = jnp.sum(shifted, axis=-1, keepdims=True)  # (TM, 1)

        loss = lse - confidence * onehot_sum - smooth_w * row_sum  # (TM, 1)

        # Mask rows beyond the true batch size (ragged last block reads
        # unspecified data; the select zeros out any NaN/Inf it produced —
        # all reductions above are per-row, so garbage cannot leak across rows).
        row_ids = pid * tm + lax.broadcasted_iota(jnp.int32, (tm, 1), 0)
        out_ref[...] = jnp.where(row_ids < n_true, loss, 0.0)

    return kernel


@functools.partial(jax.jit, static_argnames=("smoothing", "block_rows"))
def label_smoothing_cross_entropy(x, target, smoothing=SMOOTHING, block_rows=None):
    """x: (N, C) float logits; target: (N,) integer class ids. Returns scalar f32."""
    n, c = x.shape
    itemsize = jnp.dtype(x.dtype).itemsize

    # Row tile: ~4 MiB of input per buffer (double-buffered + f32 temps still
    # fits under the 48 MiB scoped-VMEM limit on every generation).
    if block_rows is None:
        bytes_per_row = max(1, c * itemsize)
        budget_rows = (4 * 1024 * 1024) // bytes_per_row
        tm = max(8, (min(1024, budget_rows) // 8) * 8)
        tm = min(tm, _round_up(n, 8))
    else:
        tm = max(8, _round_up(block_rows, 8))

    grid = (pl.cdiv(n, tm),)
    n_pad = grid[0] * tm

    tgt = target.astype(jnp.int32).reshape(n, 1)
    class_ids = jnp.arange(c, dtype=jnp.int32).reshape(1, c)

    kernel = _make_kernel(n, c, smoothing)

    cost = pl.CostEstimate(
        flops=6 * n_pad * c,
        transcendentals=n_pad * c + n_pad,
        bytes_accessed=n * c * itemsize + n * 4 + c * 4 + n_pad * 4,
    )

    per_row = pl.pallas_call(
        kernel,
        out_shape=jax.ShapeDtypeStruct((n_pad, 1), jnp.float32),
        grid_spec=pltpu.PrefetchScalarGridSpec(
            num_scalar_prefetch=0,
            grid=grid,
            in_specs=[
                pl.BlockSpec((1, c), lambda i: (0, 0)),    # class ids (resident)
                pl.BlockSpec((tm, c), lambda i: (i, 0)),   # logits row tile
                pl.BlockSpec((tm, 1), lambda i: (i, 0)),   # targets row tile
            ],
            out_specs=pl.BlockSpec((tm, 1), lambda i: (i, 0)),
        ),
        compiler_params=pltpu.CompilerParams(
            dimension_semantics=("parallel",),
            vmem_limit_bytes=48 * 1024 * 1024,
        ),
        cost_estimate=cost,
    )(class_ids, x, tgt)

    # Padded rows were written as exact zeros; tree-sum in JAX, divide by true N.
    return jnp.sum(per_row) / jnp.float32(n)


def _reference(x, target, smoothing=SMOOTHING):
    log_probs = jax.nn.log_softmax(x.astype(jnp.float32), axis=-1)
    nll = -jnp.take_along_axis(log_probs, target[:, None], axis=-1)[:, 0]
    smooth = -jnp.mean(log_probs, axis=-1)
    return jnp.mean((1.0 - smoothing) * nll + smoothing * smooth)


if __name__ == "__main__":
    key = jax.random.PRNGKey(0)
    k1x, k1t, k2x, k2t, k3x, k3t = jax.random.split(key, 6)

    # Test 1: small shapes matching the module usage (batch=8, classes=16).
    N1, C1 = 8, 16
    x1 = jax.random.normal(k1x, (N1, C1), dtype=jnp.float32)
    t1 = jax.random.randint(k1t, (N1,), 0, C1, dtype=jnp.int32)
    loss1 = jax.block_until_ready(label_smoothing_cross_entropy(x1, t1))
    ref1 = jax.block_until_ready(_reference(x1, t1))
    assert jnp.allclose(loss1, ref1, atol=1e-5, rtol=1e-5), (loss1, ref1)

    # Test 2: ragged N and C (exercises the unpadded full-C block, the ragged
    # last row block and multi-block output with a forced small row tile).
    N2, C2 = 37, 21
    x2 = jax.random.normal(k2x, (N2, C2), dtype=jnp.float32)
    t2 = jax.random.randint(k2t, (N2,), 0, C2, dtype=jnp.int32)
    loss2 = jax.block_until_ready(
        label_smoothing_cross_entropy(x2, t2, block_rows=8))
    ref2 = jax.block_until_ready(_reference(x2, t2))
    assert jnp.allclose(loss2, ref2, atol=1e-5, rtol=1e-5), (loss2, ref2)

    # Test 3: bf16 logits stay bf16 in HBM (half the DMA bytes); in-kernel f32
    # upcast matches the f32 reference on the upcast values exactly.
    N3, C3 = 24, 16
    x3 = jax.random.normal(k3x, (N3, C3), dtype=jnp.float32).astype(jnp.bfloat16)
    t3 = jax.random.randint(k3t, (N3,), 0, C3, dtype=jnp.int32)
    loss3 = jax.block_until_ready(label_smoothing_cross_entropy(x3, t3))
    ref3 = jax.block_until_ready(_reference(x3.astype(jnp.float32), t3))
    assert jnp.allclose(loss3, ref3, atol=1e-5, rtol=1e-5), (loss3, ref3)

    print("KERNEL_OK")
</pallas_src>

<mosaic_0001>
module attributes {stable_mosaic.version = 11 : i64} {
  func.func @kernel(%arg0: i32, %arg1: memref<1x16xi32, #tpu.memory_space<vmem>>, %arg2: memref<8x16xf32, #tpu.memory_space<vmem>>, %arg3: memref<8x1xi32, #tpu.memory_space<vmem>>, %arg4: memref<8x1xf32, #tpu.memory_space<vmem>>) attributes {dimension_semantics = [#tpu.dimension_semantics<parallel>], iteration_bounds = array<i64: 1>, scalar_prefetch = 0 : i64, scratch_operands = 0 : i64, tpu.core_type = #tpu.core_type<tc>, window_params = [{pipeline_mode = #tpu.pipeline_mode<synchronous>, transform_indices = @transform_0, window_bounds = array<i64: 1, 16>}, {transform_indices = @transform_1, window_bounds = array<i64: 8, 16>}, {transform_indices = @transform_2, window_bounds = array<i64: 8, 1>}, {transform_indices = @transform_3, window_bounds = array<i64: 8, 1>}]} {
    %c0 = arith.constant 0 : index
    %c0_0 = arith.constant 0 : index
    %0 = vector.load %arg2[%c0, %c0_0] : memref<8x16xf32, #tpu.memory_space<vmem>>, vector<8x16xf32>
    %cst = arith.constant dense<0xFF800000> : vector<8xf32>
    %1 = vector.multi_reduction <maximumf>, %0, %cst [1] : vector<8x16xf32> to vector<8xf32>
    %2 = vector.shape_cast %1 : vector<8xf32> to vector<8x1xf32>
    %3 = vector.broadcast %2 : vector<8x1xf32> to vector<8x16xf32>
    %4 = arith.subf %0, %3 : vector<8x16xf32>
    %5 = math.exp %4 : vector<8x16xf32>
    %cst_1 = arith.constant dense<0.000000e+00> : vector<8xf32>
    %6 = vector.multi_reduction <add>, %5, %cst_1 [1] : vector<8x16xf32> to vector<8xf32>
    %7 = vector.shape_cast %6 : vector<8xf32> to vector<8x1xf32>
    %8 = math.log %7 : vector<8x1xf32>
    %c0_2 = arith.constant 0 : index
    %c0_3 = arith.constant 0 : index
    %9 = vector.load %arg3[%c0_2, %c0_3] : memref<8x1xi32, #tpu.memory_space<vmem>>, vector<8x1xi32>
    %c0_4 = arith.constant 0 : index
    %c0_5 = arith.constant 0 : index
    %10 = vector.load %arg1[%c0_4, %c0_5] : memref<1x16xi32, #tpu.memory_space<vmem>>, vector<1x16xi32>
    %11 = vector.broadcast %10 : vector<1x16xi32> to vector<8x16xi32>
    %12 = vector.broadcast %9 : vector<8x1xi32> to vector<8x16xi32>
    %13 = arith.cmpi eq, %11, %12 : vector<8x16xi32>
    %cst_6 = arith.constant 0.000000e+00 : f32
    %14 = vector.broadcast %cst_6 : f32 to vector<8x16xf32>
    %15 = arith.select %13, %4, %14 : vector<8x16xi1>, vector<8x16xf32>
    %cst_7 = arith.constant dense<0.000000e+00> : vector<8xf32>
    %16 = vector.multi_reduction <add>, %15, %cst_7 [1] : vector<8x16xf32> to vector<8xf32>
    %17 = vector.shape_cast %16 : vector<8xf32> to vector<8x1xf32>
    %cst_8 = arith.constant dense<0.000000e+00> : vector<8xf32>
    %18 = vector.multi_reduction <add>, %4, %cst_8 [1] : vector<8x16xf32> to vector<8xf32>
    %19 = vector.shape_cast %18 : vector<8xf32> to vector<8x1xf32>
    %cst_9 = arith.constant 0.899999976 : f32
    %20 = vector.broadcast %cst_9 : f32 to vector<8x1xf32>
    %21 = arith.mulf %20, %17 : vector<8x1xf32>
    %22 = arith.subf %8, %21 : vector<8x1xf32>
    %cst_10 = arith.constant 6.250000e-03 : f32
    %23 = vector.broadcast %cst_10 : f32 to vector<8x1xf32>
    %24 = arith.mulf %23, %19 : vector<8x1xf32>
    %25 = arith.subf %22, %24 : vector<8x1xf32>
    %c8_i32 = arith.constant 8 : i32
    %26 = arith.muli %arg0, %c8_i32 : i32
    %27 = tpu.iota {dimensions = array<i32: 0>} : vector<8x1xi32>
    %28 = vector.broadcast %26 : i32 to vector<8x1xi32>
    %29 = arith.addi %28, %27 : vector<8x1xi32>
    %c8_i32_11 = arith.constant 8 : i32
    %30 = vector.broadcast %c8_i32_11 : i32 to vector<8x1xi32>
    %31 = arith.cmpi slt, %29, %30 : vector<8x1xi32>
    %cst_12 = arith.constant 0.000000e+00 : f32
    %32 = vector.broadcast %cst_12 : f32 to vector<8x1xf32>
    %33 = arith.select %31, %25, %32 : vector<8x1xi1>, vector<8x1xf32>
    %c0_13 = arith.constant 0 : index
    %c0_14 = arith.constant 0 : index
    %34 = vector.load %arg4[%c0_13, %c0_14] : memref<8x1xf32, #tpu.memory_space<vmem>>, vector<8x1xf32>
    tpu.vector_store %arg4[%c0_13, %c0_14], %33 {strides = array<i32>} : memref<8x1xf32, #tpu.memory_space<vmem>>, vector<8x1xf32>,
    return
  }
  func.func @transform_0(%arg0: i32) -> (i32, i32) {
    %c0_i32 = arith.constant 0 : i32
    %c0_i32_0 = arith.constant 0 : i32
    %c0_i32_1 = arith.constant 0 : i32
    return %c0_i32, %c0_i32_0 : i32, i32
  }
  func.func @transform_1(%arg0: i32) -> (i32, i32) {
    %c0_i32 = arith.constant 0 : i32
    %c0_i32_0 = arith.constant 0 : i32
    return %arg0, %c0_i32 : i32, i32
  }
  func.func @transform_2(%arg0: i32) -> (i32, i32) {
    %c0_i32 = arith.constant 0 : i32
    %c0_i32_0 = arith.constant 0 : i32
    return %arg0, %c0_i32 : i32, i32
  }
  func.func @transform_3(%arg0: i32) -> (i32, i32) {
    %c0_i32 = arith.constant 0 : i32
    %c0_i32_0 = arith.constant 0 : i32
    return %arg0, %c0_i32 : i32, i32
  }
}

</mosaic_0001>

<bundles_post_ra>
// kernel: label_smoothing_cross_entropy.1
= control target key start
LH: loop header
LB: loop body
LE: loop exit
PB: predicated region body
PF: predicated region fallthrough
CT: control target
= control target key end

     0   :  { %vm15_vm0 = vcmask 130048   ;;  %v68_v1 = vmov 0   ;;  %vm55_vm2 = vcmask 7168   ;;  %s105_s1 = inlined_call_operand.vmem [shape: f32[8,16], index: 1, kind: input, shape index: {}]   ;;  %s106_s2 = inlined_call_operand.vmem [shape: s32[8,1], index: 2, kind: input, shape index: {}]   ;;  %s107_s0 = inlined_call_operand.vmem [shape: s32[1,16], index: 0, kind: input, shape index: {}]   ;;  %s108_s3 = inlined_call_operand.vmem [shape: f32[8,1], index: 3, kind: output, shape index: {}]  }
   0x1   :  { %v14_v0 = vld [vmem:[%s105_s1] sm:$0xff]  ;;  %63 = vset.pattern.permute.xlu0 %v68_v1 }
   0x2   :  { %v16_v2 = vsel %vm15_vm0, %v14_v0, -inf  ;;  %v27_v3 = vld [vmem:[%s106_s2] sm:$0xff] }
   0x3   :  { %17 = vmax.xlane.f32.xlu0 %v16_v2  ;;  %v61_v8 = vld [vmem:[%s107_s0] ss:$0 sm:$0xff] }
  0x19   :  { %34 = vperm.xlu0 %63, %v27_v3  }
  0x8c   :  { %v18_v4 = vpop.xlane.xlu0 %17 }
  0x8d   :  { %v19_v5 = vsub.f32 %v14_v0, %v18_v4 }
  0x8f   :  { %v20_v6 = vmul.f32 1.442695, %v19_v5  ;;  %v41_v13 = vsel %vm15_vm0, %v19_v5, 0.0 }
  0x91   :  { %64 = vpow2.f32 %v20_v6 }
  0x94   :  { %v35_v7 = vpop.permute.xlu0 %34 }
  0x95   :  { %vm36_vm1 = vcmp.eq.s32.totalorder %v61_v8, %v35_v7 }
  0x96   :  { %v37_v11 = vsel %vm36_vm1, %v19_v5, 0.0 }
  0x97   :  { %v38_v12 = vsel %vm15_vm0, %v37_v11, 0.0 }
  0x9e   :  { %v65_v9 = vpop.eup %64 }
  0x9f   :  { %v22_v10 = vsel %vm15_vm0, %v65_v9, 0.0 }
  0xa0   :  { %23 = vadd.xlane.f32.xlu1 %v22_v10 }
  0xa4   :  { %39 = vadd.xlane.f32.xlu1 %v38_v12 }
  0xa8   :  { %42 = vadd.xlane.f32.xlu1 %v41_v13 }
 0x129   :  { %v24_v14 = vpop.xlane.xlu1 %23 }
 0x12a   :  { %66 = vlog2.f32 %v24_v14 }
 0x12d   :  { %v40_v15 = vpop.xlane.xlu1 %39 }
 0x12e   :  { %v44_v19 = vmul.f32 0.9, %v40_v15 }
 0x131   :  { %v43_v17 = vpop.xlane.xlu1 %42 }
 0x132   :  { %v46_v21 = vmul.f32 0.00625, %v43_v17 }
 0x137   :  { %v67_v16 = vpop.eup %66 }
 0x138   :  { %v26_v18 = vmul.f32 0.6931472, %v67_v16 }
 0x13a   :  { %v45_v20 = vsub.f32 %v26_v18, %v44_v19 }
 0x13c   :  { %v47_v22 = vsub.f32 %v45_v20, %v46_v21 }
 0x13e   :  { %56 = vst.msk [vmem:[%s108_s3] sm:$0xff] %vm55_vm2, %v47_v22 }

</bundles_post_ra>
